<compile_context>
chip_gen: v6e
topology: v6e:2x2x1
jax: 0.10.0
libtpu: 0.0.40
codegen_flags: <defaults>
</compile_context>

<pallas_src>
import functools

import jax
import jax.numpy as jnp
from jax.experimental import pallas as pl
from jax.experimental.pallas import tpu as pltpu

LN_EPS = 1e-5                      # nn.LayerNorm default
_INV_SQRT2 = 0.7071067811865475    # 1/sqrt(2)


def _ffn_kernel(x_ref, ln_w_ref, ln_b_ref, w1_ref, b1_ref, w2_ref, b2_ref,
                o_ref, xn_ref, acc_ref):
    """Grid: (token_tile i [parallel], hidden_tile h [arbitrary])."""
    h_idx = pl.program_id(1)

    # ---- per-token-tile init: LayerNorm (f32) + zero the accumulator ----
    @pl.when(h_idx == 0)
    def _():
        x = x_ref[...].astype(jnp.float32)
        mean = jnp.mean(x, axis=-1, keepdims=True)
        xc = x - mean
        var = jnp.mean(xc * xc, axis=-1, keepdims=True)
        inv = jax.lax.rsqrt(var + LN_EPS)
        xn = xc * inv
        xn = xn * ln_w_ref[...].astype(jnp.float32) \
             + ln_b_ref[...].astype(jnp.float32)
        xn_ref[...] = xn.astype(xn_ref.dtype)      # cached in matmul dtype
        acc_ref[...] = jnp.zeros_like(acc_ref)

    # ---- Linear(dim -> th hidden slice), MXU in weight dtype, f32 acc ----
    h = jnp.dot(xn_ref[...], w1_ref[...], preferred_element_type=jnp.float32)
    h = h + b1_ref[...].astype(jnp.float32)

    # ---- GELU (exact, erf-based; matches nn.GELU default) ----
    h = 0.5 * h * (1.0 + jax.lax.erf(h * _INV_SQRT2))

    # Dropout: identity in eval mode.

    # ---- Linear(hidden slice -> dim), accumulate into f32 scratch ----
    acc_ref[...] += jnp.dot(h.astype(w2_ref.dtype), w2_ref[...],
                            preferred_element_type=jnp.float32)

    # ---- finalize: add output bias, store lane-dense (tm, D) tile ----
    @pl.when(h_idx == pl.num_programs(1) - 1)
    def _():
        y = acc_ref[...] + b2_ref[...].astype(jnp.float32)
        o_ref[...] = y.astype(o_ref.dtype)


def _round_up(a, b):
    return (a + b - 1) // b * b


@functools.partial(jax.jit, static_argnames=("tm", "th"))
def feed_forward(x, ln_w, ln_b, w1, b1, w2, b2, *, tm=256, th=512):
    """x: (B, S, D).  Weights follow PyTorch Linear convention transposed to (in, out)."""
    B, S, D = x.shape
    H = w1.shape[1]
    T = B * S
    x2 = x.reshape(T, D)

    # --- token tiling: multiple of 8 sublanes, clamped to small inputs ---
    tm_eff = min(tm, _round_up(T, 8))
    T_pad = _round_up(T, tm_eff)
    if T_pad != T:
        x2 = jnp.pad(x2, ((0, T_pad - T), (0, 0)))

    # --- hidden tiling: th multiple of 128 (or full H for small H) ---
    if H <= th:
        th_eff, H_pad = H, H
    else:
        th_eff = th                      # multiple of 128 by construction
        H_pad = _round_up(H, th_eff)
    if H_pad != H:
        # Zero-padding the hidden dim is exact: gelu(0 + 0) = 0 and the padded
        # w2 rows are zero, so padded columns contribute nothing.
        w1 = jnp.pad(w1, ((0, 0), (0, H_pad - H)))
        b1 = jnp.pad(b1, ((0, H_pad - H),))
        w2 = jnp.pad(w2, ((0, H_pad - H), (0, 0)))

    compute_dtype = w1.dtype             # matmul operand dtype (e.g. bf16 or f32)

    grid = (T_pad // tm_eff, H_pad // th_eff)

    # --- VMEM budget: tiles are double-buffered; cap at 64 MiB (v7x-safe) ---
    isz = lambda dt: jnp.dtype(dt).itemsize
    est = (
        2 * tm_eff * D * isz(x2.dtype)                  # x tiles
        + 2 * tm_eff * D * isz(x.dtype)                 # output tiles
        + 2 * (D * th_eff + th_eff) * isz(w1.dtype)     # w1 + b1 tiles
        + 2 * th_eff * D * isz(w2.dtype)                # w2 tiles
        + 6 * D * 4                                     # ln_w, ln_b, b2 (small)
        + tm_eff * D * isz(compute_dtype)               # xn scratch
        + tm_eff * D * 4                                # f32 accumulator
    )
    vmem_limit = int(min(max(2 * est, 32 * 1024 * 1024), 64 * 1024 * 1024))

    out = pl.pallas_call(
        _ffn_kernel,
        out_shape=jax.ShapeDtypeStruct((T_pad, D), x.dtype),
        grid_spec=pltpu.PrefetchScalarGridSpec(
            num_scalar_prefetch=0,
            grid=grid,
            in_specs=[
                pl.BlockSpec((tm_eff, D), lambda i, h: (i, 0)),    # x tile
                pl.BlockSpec((1, D), lambda i, h: (0, 0)),         # ln weight
                pl.BlockSpec((1, D), lambda i, h: (0, 0)),         # ln bias
                pl.BlockSpec((D, th_eff), lambda i, h: (0, h)),    # w1 col block
                pl.BlockSpec((1, th_eff), lambda i, h: (0, h)),    # b1 slice
                pl.BlockSpec((th_eff, D), lambda i, h: (h, 0)),    # w2 row block
                pl.BlockSpec((1, D), lambda i, h: (0, 0)),         # b2
            ],
            out_specs=pl.BlockSpec((tm_eff, D), lambda i, h: (i, 0)),
            scratch_shapes=[
                pltpu.VMEM((tm_eff, D), compute_dtype),            # cached LN(x)
                pltpu.VMEM((tm_eff, D), jnp.float32),              # y accumulator
            ],
        ),
        compiler_params=pltpu.CompilerParams(
            dimension_semantics=("parallel", "arbitrary"),
            vmem_limit_bytes=vmem_limit,
        ),
    )(x2, ln_w.reshape(1, D), ln_b.reshape(1, D),
      w1, b1.reshape(1, H_pad), w2, b2.reshape(1, D))

    # TODO(synk): for models whose D is not a multiple of 128, the output store
    # uses masked vst; padding D would require masking the LayerNorm statistics.
    return out[:T].reshape(B, S, D)


def _reference(x, ln_w, ln_b, w1, b1, w2, b2):
    xf = x.astype(jnp.float32)
    mean = jnp.mean(xf, axis=-1, keepdims=True)
    var = jnp.mean((xf - mean) ** 2, axis=-1, keepdims=True)
    xn = (xf - mean) * jax.lax.rsqrt(var + LN_EPS) * ln_w + ln_b
    h = xn @ w1 + b1
    h = 0.5 * h * (1.0 + jax.lax.erf(h * _INV_SQRT2))
    y = h @ w2 + b2
    return y.astype(x.dtype)


if __name__ == "__main__":
    B, S, D, HID = 2, 8, 32, 64

    key = jax.random.PRNGKey(0)
    kx, k1, k2, k3, k4 = jax.random.split(key, 5)

    x = jax.random.normal(kx, (B, S, D), dtype=jnp.float32)

    # Deterministic parameter init (shapes from the module's __init__).
    ln_w = jnp.ones((D,), jnp.float32)
    ln_b = jnp.zeros((D,), jnp.float32)
    # nn.Linear weights stored (out, in) in torch; keep (in, out) here for y = x @ W.
    w1 = jax.random.normal(k1, (D, HID), jnp.float32) * 0.02
    b1 = jax.random.normal(k2, (HID,), jnp.float32) * 0.01
    w2 = jax.random.normal(k3, (HID, D), jnp.float32) * 0.02
    b2 = jax.random.normal(k4, (D,), jnp.float32) * 0.01

    y = feed_forward(x, ln_w, ln_b, w1, b1, w2, b2)
    y = jax.block_until_ready(y)

    y_ref = _reference(x, ln_w, ln_b, w1, b1, w2, b2)
    assert jnp.allclose(y, y_ref, atol=1e-4, rtol=1e-4), "mismatch vs reference"

    print("KERNEL_OK")
</pallas_src>

<mosaic_0001>
module attributes {stable_mosaic.version = 11 : i64} {
  func.func @_ffn_kernel(%arg0: i32, %arg1: i32, %arg2: memref<16x32xf32, #tpu.memory_space<vmem>>, %arg3: memref<1x32xf32, #tpu.memory_space<vmem>>, %arg4: memref<1x32xf32, #tpu.memory_space<vmem>>, %arg5: memref<32x64xf32, #tpu.memory_space<vmem>>, %arg6: memref<1x64xf32, #tpu.memory_space<vmem>>, %arg7: memref<64x32xf32, #tpu.memory_space<vmem>>, %arg8: memref<1x32xf32, #tpu.memory_space<vmem>>, %arg9: memref<16x32xf32, #tpu.memory_space<vmem>>, %arg10: memref<16x32xf32, #tpu.memory_space<vmem>>, %arg11: memref<16x32xf32, #tpu.memory_space<vmem>>) attributes {dimension_semantics = [#tpu.dimension_semantics<parallel>, #tpu.dimension_semantics<arbitrary>], iteration_bounds = array<i64: 1, 1>, scalar_prefetch = 0 : i64, scratch_operands = 2 : i64, tpu.core_type = #tpu.core_type<tc>, window_params = [{transform_indices = @transform_0, window_bounds = array<i64: 16, 32>}, {pipeline_mode = #tpu.pipeline_mode<synchronous>, transform_indices = @transform_1, window_bounds = array<i64: 1, 32>}, {pipeline_mode = #tpu.pipeline_mode<synchronous>, transform_indices = @transform_2, window_bounds = array<i64: 1, 32>}, {transform_indices = @transform_3, window_bounds = array<i64: 32, 64>}, {transform_indices = @transform_4, window_bounds = array<i64: 1, 64>}, {transform_indices = @transform_5, window_bounds = array<i64: 64, 32>}, {pipeline_mode = #tpu.pipeline_mode<synchronous>, transform_indices = @transform_6, window_bounds = array<i64: 1, 32>}, {transform_indices = @transform_7, window_bounds = array<i64: 16, 32>}]} {
    %c0_i32 = arith.constant 0 : i32
    %0 = arith.cmpi eq, %arg1, %c0_i32 : i32
    %1 = arith.extui %0 : i1 to i32
    %c0_i32_0 = arith.constant 0 : i32
    %2 = arith.cmpi ne, %1, %c0_i32_0 : i32
    scf.if %2 {
      %c0_18 = arith.constant 0 : index
      %c0_19 = arith.constant 0 : index
      %25 = vector.load %arg2[%c0_18, %c0_19] : memref<16x32xf32, #tpu.memory_space<vmem>>, vector<16x32xf32>
      %cst_20 = arith.constant dense<0.000000e+00> : vector<16xf32>
      %26 = vector.multi_reduction <add>, %25, %cst_20 [1] : vector<16x32xf32> to vector<16xf32>
      %27 = vector.shape_cast %26 : vector<16xf32> to vector<16x1xf32>
      %cst_21 = arith.constant 3.200000e+01 : f32
      %28 = vector.broadcast %cst_21 : f32 to vector<16x1xf32>
      %29 = arith.divf %27, %28 : vector<16x1xf32>
      %30 = vector.broadcast %29 : vector<16x1xf32> to vector<16x32xf32>
      %31 = arith.subf %25, %30 : vector<16x32xf32>
      %32 = arith.mulf %31, %31 : vector<16x32xf32>
      %cst_22 = arith.constant dense<0.000000e+00> : vector<16xf32>
      %33 = vector.multi_reduction <add>, %32, %cst_22 [1] : vector<16x32xf32> to vector<16xf32>
      %34 = vector.shape_cast %33 : vector<16xf32> to vector<16x1xf32>
      %cst_23 = arith.constant 3.200000e+01 : f32
      %35 = vector.broadcast %cst_23 : f32 to vector<16x1xf32>
      %36 = arith.divf %34, %35 : vector<16x1xf32>
      %cst_24 = arith.constant 9.99999974E-6 : f32
      %37 = vector.broadcast %cst_24 : f32 to vector<16x1xf32>
      %38 = arith.addf %36, %37 : vector<16x1xf32>
      %39 = math.rsqrt %38 : vector<16x1xf32>
      %40 = vector.broadcast %39 : vector<16x1xf32> to vector<16x32xf32>
      %41 = arith.mulf %31, %40 : vector<16x32xf32>
      %c0_25 = arith.constant 0 : index
      %c0_26 = arith.constant 0 : index
      %42 = vector.load %arg3[%c0_25, %c0_26] : memref<1x32xf32, #tpu.memory_space<vmem>>, vector<1x32xf32>
      %43 = vector.broadcast %42 : vector<1x32xf32> to vector<16x32xf32>
      %44 = arith.mulf %41, %43 : vector<16x32xf32>
      %c0_27 = arith.constant 0 : index
      %c0_28 = arith.constant 0 : index
      %45 = vector.load %arg4[%c0_27, %c0_28] : memref<1x32xf32, #tpu.memory_space<vmem>>, vector<1x32xf32>
      %46 = vector.broadcast %45 : vector<1x32xf32> to vector<16x32xf32>
      %47 = arith.addf %44, %46 : vector<16x32xf32>
      %c0_29 = arith.constant 0 : index
      %c0_30 = arith.constant 0 : index
      %48 = vector.load %arg10[%c0_29, %c0_30] : memref<16x32xf32, #tpu.memory_space<vmem>>, vector<16x32xf32>
      tpu.vector_store %arg10[%c0_29, %c0_30], %47 {strides = array<i32>} : memref<16x32xf32, #tpu.memory_space<vmem>>, vector<16x32xf32>,
      %cst_31 = arith.constant 0.000000e+00 : f32
      %49 = vector.broadcast %cst_31 : f32 to vector<16x32xf32>
      %c0_32 = arith.constant 0 : index
      %c0_33 = arith.constant 0 : index
      %50 = vector.load %arg11[%c0_32, %c0_33] : memref<16x32xf32, #tpu.memory_space<vmem>>, vector<16x32xf32>
      tpu.vector_store %arg11[%c0_32, %c0_33], %49 {strides = array<i32>} : memref<16x32xf32, #tpu.memory_space<vmem>>, vector<16x32xf32>,
    } else {
    }
    %c0 = arith.constant 0 : index
    %c0_1 = arith.constant 0 : index
    %3 = vector.load %arg10[%c0, %c0_1] : memref<16x32xf32, #tpu.memory_space<vmem>>, vector<16x32xf32>
    %c0_2 = arith.constant 0 : index
    %c0_3 = arith.constant 0 : index
    %4 = vector.load %arg5[%c0_2, %c0_3] : memref<32x64xf32, #tpu.memory_space<vmem>>, vector<32x64xf32>
    %cst = arith.constant dense<0.000000e+00> : vector<16x64xf32>
    %5 = tpu.matmul %3, %4, %cst {dimension_numbers = #tpu.dot_dimension_numbers<[1], [0], [0], [1], [0, 0, 1, 1], [], []>} : vector<16x32xf32>, vector<32x64xf32>, vector<16x64xf32> -> vector<16x64xf32>
    %c0_4 = arith.constant 0 : index
    %c0_5 = arith.constant 0 : index
    %6 = vector.load %arg6[%c0_4, %c0_5] : memref<1x64xf32, #tpu.memory_space<vmem>>, vector<1x64xf32>
    %7 = vector.broadcast %6 : vector<1x64xf32> to vector<16x64xf32>
    %8 = arith.addf %5, %7 : vector<16x64xf32>
    %cst_6 = arith.constant 5.000000e-01 : f32
    %9 = vector.broadcast %cst_6 : f32 to vector<16x64xf32>
    %10 = arith.mulf %9, %8 : vector<16x64xf32>
    %cst_7 = arith.constant 0.707106769 : f32
    %11 = vector.broadcast %cst_7 : f32 to vector<16x64xf32>
    %12 = arith.mulf %8, %11 : vector<16x64xf32>
    %13 = math.erf %12 : vector<16x64xf32>
    %cst_8 = arith.constant 1.000000e+00 : f32
    %14 = vector.broadcast %cst_8 : f32 to vector<16x64xf32>
    %15 = arith.addf %14, %13 : vector<16x64xf32>
    %16 = arith.mulf %10, %15 : vector<16x64xf32>
    %c0_9 = arith.constant 0 : index
    %c0_10 = arith.constant 0 : index
    %17 = vector.load %arg11[%c0_9, %c0_10] : memref<16x32xf32, #tpu.memory_space<vmem>>, vector<16x32xf32>
    %c0_11 = arith.constant 0 : index
    %c0_12 = arith.constant 0 : index
    %18 = vector.load %arg7[%c0_11, %c0_12] : memref<64x32xf32, #tpu.memory_space<vmem>>, vector<64x32xf32>
    %cst_13 = arith.constant dense<0.000000e+00> : vector<16x32xf32>
    %19 = tpu.matmul %16, %18, %cst_13 {dimension_numbers = #tpu.dot_dimension_numbers<[1], [0], [0], [1], [0, 0, 1, 1], [], []>} : vector<16x64xf32>, vector<64x32xf32>, vector<16x32xf32> -> vector<16x32xf32>
    %20 = arith.addf %17, %19 : vector<16x32xf32>
    %c0_14 = arith.constant 0 : index
    %c0_15 = arith.constant 0 : index
    %21 = vector.load %arg11[%c0_14, %c0_15] : memref<16x32xf32, #tpu.memory_space<vmem>>, vector<16x32xf32>
    tpu.vector_store %arg11[%c0_14, %c0_15], %20 {strides = array<i32>} : memref<16x32xf32, #tpu.memory_space<vmem>>, vector<16x32xf32>,
    %c0_i32_16 = arith.constant 0 : i32
    %22 = arith.cmpi eq, %arg1, %c0_i32_16 : i32
    %23 = arith.extui %22 : i1 to i32
    %c0_i32_17 = arith.constant 0 : i32
    %24 = arith.cmpi ne, %23, %c0_i32_17 : i32
    scf.if %24 {
      %c0_18 = arith.constant 0 : index
      %c0_19 = arith.constant 0 : index
      %25 = vector.load %arg11[%c0_18, %c0_19] : memref<16x32xf32, #tpu.memory_space<vmem>>, vector<16x32xf32>
      %c0_20 = arith.constant 0 : index
      %c0_21 = arith.constant 0 : index
      %26 = vector.load %arg8[%c0_20, %c0_21] : memref<1x32xf32, #tpu.memory_space<vmem>>, vector<1x32xf32>
      %27 = vector.broadcast %26 : vector<1x32xf32> to vector<16x32xf32>
      %28 = arith.addf %25, %27 : vector<16x32xf32>
      %c0_22 = arith.constant 0 : index
      %c0_23 = arith.constant 0 : index
      %29 = vector.load %arg9[%c0_22, %c0_23] : memref<16x32xf32, #tpu.memory_space<vmem>>, vector<16x32xf32>
      tpu.vector_store %arg9[%c0_22, %c0_23], %28 {strides = array<i32>} : memref<16x32xf32, #tpu.memory_space<vmem>>, vector<16x32xf32>,
    } else {
    }
    return
  }
  func.func @transform_0(%arg0: i32, %arg1: i32) -> (i32, i32) {
    %c0_i32 = arith.constant 0 : i32
    %c0_i32_0 = arith.constant 0 : i32
    return %arg0, %c0_i32 : i32, i32
  }
  func.func @transform_1(%arg0: i32, %arg1: i32) -> (i32, i32) {
    %c0_i32 = arith.constant 0 : i32
    %c0_i32_0 = arith.constant 0 : i32
    %c0_i32_1 = arith.constant 0 : i32
    return %c0_i32, %c0_i32_0 : i32, i32
  }
  func.func @transform_2(%arg0: i32, %arg1: i32) -> (i32, i32) {
    %c0_i32 = arith.constant 0 : i32
    %c0_i32_0 = arith.constant 0 : i32
    %c0_i32_1 = arith.constant 0 : i32
    return %c0_i32, %c0_i32_0 : i32, i32
  }
  func.func @transform_3(%arg0: i32, %arg1: i32) -> (i32, i32) {
    %c0_i32 = arith.constant 0 : i32
    %c0_i32_0 = arith.constant 0 : i32
    return %c0_i32, %arg1 : i32, i32
  }
  func.func @transform_4(%arg0: i32, %arg1: i32) -> (i32, i32) {
    %c0_i32 = arith.constant 0 : i32
    %c0_i32_0 = arith.constant 0 : i32
    return %c0_i32, %arg1 : i32, i32
  }
  func.func @transform_5(%arg0: i32, %arg1: i32) -> (i32, i32) {
    %c0_i32 = arith.constant 0 : i32
    %c0_i32_0 = arith.constant 0 : i32
    return %arg1, %c0_i32 : i32, i32
  }
  func.func @transform_6(%arg0: i32, %arg1: i32) -> (i32, i32) {
    %c0_i32 = arith.constant 0 : i32
    %c0_i32_0 = arith.constant 0 : i32
    %c0_i32_1 = arith.constant 0 : i32
    return %c0_i32, %c0_i32_0 : i32, i32
  }
  func.func @transform_7(%arg0: i32, %arg1: i32) -> (i32, i32) {
    %c0_i32 = arith.constant 0 : i32
    %c0_i32_0 = arith.constant 0 : i32
    return %arg0, %c0_i32 : i32, i32
  }
}

</mosaic_0001>

<bundles_post_ra>
// kernel: feed_forward.1
= control target key start
LH: loop header
LB: loop body
LE: loop exit
PB: predicated region body
PF: predicated region fallthrough
CT: control target
= control target key end

     0   :  { %vm33_vm0 = vcmask 261120   ;;  %s519_s0 = inlined_call_operand.vmem [shape: f32[16,32], index: 0, kind: input, shape index: {}]   ;;  %s520_s1 = inlined_call_operand.vmem [shape: f32[1,32], index: 1, kind: input, shape index: {}]   ;;  %s521_s2 = inlined_call_operand.vmem [shape: f32[1,32], index: 2, kind: input, shape index: {}]   ;;  %s522_s3 = inlined_call_operand.vmem [shape: f32[32,64], index: 3, kind: input, shape index: {}]   ;;  %s523_s4 = inlined_call_operand.vmem [shape: f32[1,64], index: 4, kind: input, shape index: {}]   ;;  %s524_s5 = inlined_call_operand.vmem [shape: f32[64,32], index: 5, kind: input, shape index: {}]   ;;  %s525_s6 = inlined_call_operand.vmem [shape: f32[1,32], index: 6, kind: input, shape index: {}]   ;;  %s526_s7 = inlined_call_operand.hbm [shape: f32[16,32], index: 7, kind: output, shape index: {}]  }
   0x1   :  { %v31_v0 = vld [vmem:[%s519_s0] sm:$0xff]  ;;  %v32_v1 = vld [vmem:[%s519_s0 + $0x8] sm:$0xff] }
   0x2   :  { %12 = vsyncpa [#allocation5], 0  ;;  %v34_v2 = vsel %vm33_vm0, %v31_v0, 0.0  ;;  %v37_v3 = vsel %vm33_vm0, %v32_v1, 0.0  ;;  %v88_v14 = vld [vmem:[%s522_s3 + $0x18] sm:$0xff]  ;;  %v87_v15 = vld [vmem:[%s522_s3 + $0x10] sm:$0xff] }
   0x3   :  { %35 = vadd.xlane.f32.xlu0 %v34_v2  ;;  %340 = vmatprep.subr.mxu0 %v88_v14  ;;  %v86_v16 = vld [vmem:[%s522_s3 + $0x8] sm:$0xff]  ;;  %v85_v17 = vld [vmem:[%s522_s3] sm:$0xff]  ;;  %v197_v36 = vld [vmem:[%s524_s5 + $0x38] sm:$0xff]  ;;  %v404_v44 = vmov 0.0   ;;  %vm198_vm1 = vcmask 523264   ;;  %s405_s30 = smov [#allocation4]  }
   0x4   :  { %341 = vmatpush3.msra.mxu0 %v88_v14  ;;  %v316_v25 = vld [vmem:[%s520_s1] ss:$0 sm:$0xff]  ;;  %351 = vmatprep.subr.mxu1 %v197_v36  ;;  %v196_v37 = vld [vmem:[%s524_s5 + $0x30] sm:$0xff]  ;;  %v195_v38 = vld [vmem:[%s524_s5 + $0x28] sm:$0xff]  ;;  %82 = vst.msk [vmem:[#allocation3 + $0x8] sm:$0xff] %vm33_vm0, %v404_v44  ;;  %s305_s8 = sshll.u32 %s405_s30, 4  ;;  %s306_s8 = int_to_ptr.vmem [resolvable:$true] %s305_s8 }
   0x5   :  { %342 = vmatprep.subr.mxu0 %v87_v15  ;;  %v317_v27 = vld [vmem:[%s521_s2] ss:$0 sm:$0xff]  ;;  %352 = vmatpush3.msra.mxu1 %v197_v36  ;;  %v193_v40 = vld [vmem:[%s524_s5 + $0x18] sm:$0xff]  ;;  %v192_v41 = vld [vmem:[%s524_s5 + $0x10] sm:$0xff]  ;;  %81 = vst.msk [vmem:[#allocation3] sm:$0xff] %vm33_vm0, %v404_v44  ;;  %s382_s9 = scalar_lea.vmem %s306_s8, 256  ;;  %p387_p1 = scmp.lt.s32.totalorder %s306_s8, %s306_s8 }
   0x6   :  { %343 = vmatpush3.msra.mxu0 %v87_v15  ;;  %353 = vmatprep.subr.mxu1 %v196_v37  ;;  %v194_v39 = vld [vmem:[%s524_s5 + $0x20] sm:$0xff]  ;;  %v191_v42 = vld [vmem:[%s524_s5 + $0x8] sm:$0xff]  ;;  %p383_p0 = scmp.ne.s32.totalorder %s306_s8, %s382_s9  ;;  %p388_p2 = scmp.lt.s32.totalorder %s382_s9, %s382_s9 }
   0x7   :  { %38 = vadd.xlane.f32.xlu0 %v37_v3  ;;  %344 = vmatprep.subr.mxu0 %v86_v16  ;;  %v190_v43 = vld [vmem:[%s524_s5] sm:$0xff] }
   0x8   :  { %345 = vmatpush3.msra.mxu0 %v86_v16  ;;  %354 = vmatpush3.msra.mxu1 %v196_v37  ;;  %v318_v45 = vld [vmem:[%s523_s4] ss:$0 sm:$0xff]  ;;  %p389_p3 = por %p388_p2, %p387_p1 }
   0x9   :  { %346 = vmatprep.subr.mxu0 %v85_v17  ;;  %355 = vmatprep.subr.mxu1 %v195_v38  ;;  %v323_v2 = vld [vmem:[%s525_s6] ss:$0 sm:$0xff] }
   0xa   :  { %347 = vmatpush3.msra.mxu0 %v85_v17  ;;  %356 = vmatpush3.msra.mxu1 %v195_v38  ;;  %p390_p4 = pnand %p389_p3, %p383_p0 }
   0xb   :  { %357 = vmatprep.subr.mxu1 %v194_v39  ;;  %v189_v60 = vld [vmem:[#allocation3 + $0x8] sm:$0xff] }
   0xc   :  { %358 = vmatpush3.msra.mxu1 %v194_v39  ;;  %v188_v62 = vld [vmem:[#allocation3] sm:$0xff] }
   0xd   :  { %359 = vmatprep.subr.mxu1 %v193_v40 }
   0xe   :  { %360 = vmatpush3.msra.mxu1 %v193_v40 }
   0xf   :  { %361 = vmatprep.subr.mxu1 %v192_v41 }
  0x10   :  { %362 = vmatpush3.msra.mxu1 %v192_v41 }
  0x11   :  { %363 = vmatprep.subr.mxu1 %v191_v42 }
  0x12   :  { %364 = vmatpush3.msra.mxu1 %v191_v42 }
  0x13   :  { %365 = vmatprep.subr.mxu1 %v190_v43 }
  0x14   :  { %366 = vmatpush3.msra.mxu1 %v190_v43 }
  0x8c   :  { %v36_v4 = vpop.xlane.xlu0 %35 }
  0x8d   :  { %v41_v5 = vmul.f32 0.03125, %v36_v4 }
  0x8f   :  { %v43_v6 = vsub.f32 %v31_v0, %v41_v5 }
  0x90   :  { %v39_v7 = vpop.xlane.xlu0 %38 }
  0x91   :  { %v42_v8 = vmul.f32 0.03125, %v39_v7  ;;  %v45_v9 = vmul.f32 %v43_v6, %v43_v6 }
  0x93   :  { %v44_v10 = vsub.f32 %v32_v1, %v42_v8  ;;  %v47_v11 = vsel %vm33_vm0, %v45_v9, 0.0 }
  0x94   :  { %48 = vadd.xlane.f32.xlu1 %v47_v11 }
  0x95   :  { %v46_v12 = vmul.f32 %v44_v10, %v44_v10 }
  0x97   :  { %v50_v13 = vsel %vm33_vm0, %v46_v12, 0.0 }
  0x98   :  { %51 = vadd.xlane.f32.xlu1 %v50_v13 }
 0x11d   :  { %v49_v18 = vpop.xlane.xlu1 %48 }
 0x11e   :  { %v53_v19 = vmul.f32 0.03125, %v49_v18 }
 0x120   :  { %v55_v20 = vadd.f32 1e-05, %v53_v19 }
 0x121   :  { %v52_v21 = vpop.xlane.xlu1 %51 }
 0x122   :  { %374 = vrsqrt.f32 %v55_v20  ;;  %v54_v22 = vmul.f32 0.03125, %v52_v21 }
 0x124   :  { %v56_v23 = vadd.f32 1e-05, %v54_v22 }
 0x126   :  { %376 = vrsqrt.f32 %v56_v23 }
 0x12f   :  { %v375_v24 = vpop.eup %374 }
 0x130   :  { %v59_v26 = vmul.f32 %v375_v24, %v43_v6 }
 0x132   :  { %v68_v28 = vmul.f32 %v316_v25, %v59_v26 }
 0x133   :  { %v377_v29 = vpop.eup %376 }
 0x134   :  { %v77_v30 = vadd.f32 %v317_v27, %v68_v28  ;;  %v60_v31 = vmul.f32 %v377_v29, %v44_v10 }
 0x136   :  { %79 = vst.msk [vmem:[#allocation2] sm:$0xff] %vm33_vm0, %v77_v30  ;;  %v69_v32 = vmul.f32 %v316_v25, %v60_v31 }
 0x138   :  { %v78_v33 = vadd.f32 %v317_v27, %v69_v32 }
 0x13a   :  { %80 = vst.msk [vmem:[#allocation2 + $0x8] sm:$0xff] %vm33_vm0, %v78_v33 }
 0x13d   :  { %v83_v34 = vld [vmem:[#allocation2] sm:$0xff] }
 0x13e   :  { %348 = vmatprep.mubr.msk.f32.mxu0 %vm33_vm0, %v83_v34 }
 0x141   :  { %v84_v35 = vld [vmem:[#allocation2 + $0x8] sm:$0xff] }
 0x142   :  { %349 = vmatmul.mubr.msk.f32.vlgmr.msra.gmra.mxu0 %vm33_vm0, %v84_v35 }
 0x202   :  { %v350_v46 = vpop.f32.mrf.mxu0 }
 0x203   :  { %v175_v47 = vadd.f32 %v350_v46, %v318_v45 }
 0x204   :  { %v169_v48 = vpop.f32.mrf.mxu0 }
 0x205   :  { %v181_v49 = vmul.f32 0.70710677, %v175_v47  ;;  %v170_v50 = vadd.f32 %v318_v45, %v169_v48  ;;  %v179_v57 = vmul.f32 0.5, %v175_v47 }
 0x207   :  { %378 = verf.f32 %v181_v49  ;;  %v180_v51 = vmul.f32 0.70710677, %v170_v50  ;;  %v178_v55 = vmul.f32 0.5, %v170_v50 }
 0x209   :  { %380 = verf.f32 %v180_v51 }
 0x214   :  { %v379_v52 = vpop.eup %378 }
 0x215   :  { %v185_v54 = vadd.f32 1.0, %v379_v52 }
 0x216   :  { %v381_v53 = vpop.eup %380 }
 0x217   :  { %v184_v56 = vadd.f32 1.0, %v381_v53  ;;  %v187_v59 = vmul.f32 %v185_v54, %v179_v57 }
 0x219   :  { %v186_v58 = vmul.f32 %v184_v56, %v178_v55 }
 0x21b   :  { %367 = vmatprep.mubr.msk.f32.mxu1 %vm198_vm1, %v186_v58 }
 0x21c   :  { %368 = vmatmul.mubr.msk.f32.vlgmr.msra.gmra.mxu1 %vm198_vm1, %v187_v59 }
 0x2dc   :  { %v369_v61 = vpop.f32.mrf.mxu1 }
 0x2dd   :  { %v281_v63 = vadd.f32 %v369_v61, %v189_v60 }
 0x2de   :  { %v271_v0 = vpop.f32.mrf.mxu1 }
 0x2df   :  { %283 = vst.msk [vmem:[#allocation3 + $0x8] sm:$0xff] %vm33_vm0, %v281_v63  ;;  %v280_v1 = vadd.f32 %v271_v0, %v188_v62 }
 0x2e1   :  { %282 = vst.msk [vmem:[#allocation3] sm:$0xff] %vm33_vm0, %v280_v1 }
 0x2e6   :  { %v288_v3 = vld [vmem:[#allocation3 + $0x8] sm:$0xff] }
 0x2e7   :  { %v297_v4 = vadd.f32 %v323_v2, %v288_v3 }
 0x2e8   :  { %v287_v5 = vld [vmem:[#allocation3] sm:$0xff] }
 0x2e9   :  { %v296_v6 = vadd.f32 %v323_v2, %v287_v5  ;;  %299 = vst.msk [vmem:[#allocation4 + $0x8] sm:$0xff] %vm33_vm0, %v297_v4 }
 0x2eb   :  { %298 = vst.msk [vmem:[#allocation4] sm:$0xff] %vm33_vm0, %v296_v6 }
 0x2ec   :  { %393 = shalt.err (!%p390_p4)
}
 0x2ed   :  { %s406_s10 = smov 128   ;;  %s407_s6 = smov 8  }
 0x2ee   :  { %311 = dma.vmem_to_hbm [thread:$0]  %s306_s8, 256, %s526_s7, [#allocation5], %s406_s10, %s406_s10, %s407_s6  }
 0x2ef   :  { %402 = dma.done.wait [#allocation5], 256  }
 0x2f0   :  { %403 = vsyncadd [#allocation5], 4294967040 }
 0x2f1   :  { %315 = vsyncpa [#allocation5], 1 }

</bundles_post_ra>
